<compile_context>
chip_gen: v7x
topology: tpu7x:2x2x1
jax: 0.10.0
libtpu: 0.0.40
codegen_flags: <defaults>
</compile_context>

<pallas_src>
import functools

import jax
import jax.numpy as jnp
from jax import lax
from jax.experimental import pallas as pl
from jax.experimental.pallas import tpu as pltpu


# ---------------------------------------------------------------------------
# Kernel: grid = (row-tile g, hidden-block h). Rows are pre-sorted by expert;
# every row tile belongs to exactly one expert (groups padded to tm multiples).
# ---------------------------------------------------------------------------
def _moe_gmm_kernel(te_ref, tv_ref, x_ref, cw_ref, w13_ref, w2_ref, o_ref, acc_ref):
    g = pl.program_id(0)
    h = pl.program_id(1)
    nh = pl.num_programs(1)

    # f32 accumulator resident across the hidden-block reduction axis.
    # Unconditional so fully-padded tail tiles still write zeros.
    @pl.when(h == 0)
    def _():
        acc_ref[...] = jnp.zeros_like(acc_ref)

    # Skip compute on fully-padded tail tiles (their combine weights are 0, so
    # correctness never depends on this flag — it is a pure compute skip).
    @pl.when(tv_ref[g] > 0)
    def _():
        x = x_ref[...]          # (tm, D)  bf16
        w1 = w13_ref[0, 0]      # (th, D)  bf16  (native torch layout, rows = hidden)
        w3 = w13_ref[0, 1]      # (th, D)  bf16
        w2 = w2_ref[0]          # (D, th)  bf16  (native torch layout)

        dn = (((1,), (1,)), ((), ()))   # contract last dims: A @ B^T (MXU native)
        h1 = lax.dot_general(x, w1, dn, preferred_element_type=jnp.float32)   # (tm, th)
        h3 = lax.dot_general(x, w3, dn, preferred_element_type=jnp.float32)   # (tm, th)
        act = h1 * jax.nn.sigmoid(h1) * h3                                    # SiLU(h1)*h3
        # Fold the per-row top-k combine weight into the (tm, th) activation:
        # (w*act) @ W2^T == w * (act @ W2^T), and D >> th so this is cheaper.
        act = (cw_ref[...] * act).astype(w2.dtype)
        acc_ref[...] += lax.dot_general(act, w2, dn, preferred_element_type=jnp.float32)

    @pl.when(h == nh - 1)
    def _():
        o_ref[...] = acc_ref[...].astype(o_ref.dtype)


# ---------------------------------------------------------------------------
# Tile selection (VMEM-aware, per-generation).
# ---------------------------------------------------------------------------
def _round_up(a, b):
    return (a + b - 1) // b * b


def _vmem_tile_bytes(tm, th, d):
    x_blk = 2 * tm * d * 2                       # bf16 x, double-buffered
    w_blk = 2 * (2 * th * d * 2 + d * th * 2)    # w13 + w2 blocks, double-buffered
    cw_blk = 2 * tm * 4                          # combine weights
    out_blk = 2 * tm * d * 2                     # bf16 output, double-buffered
    acc = tm * d * 4                             # f32 scratch accumulator
    inter = 4 * tm * th * 4                      # h1/h3/act intermediates
    return x_blk + w_blk + cw_blk + out_blk + acc + inter


def _choose_tiles(T, D, H, E, k, vmem_budget, vmem_cap):
    # v7x (64 MiB VMEM, high HBM BW): target tm ~256. v5e/v6e (128 MiB): ~512.
    target_tm = 256 if vmem_cap <= 64 * 1024 * 1024 else 512
    tm_cap = max(16, min(target_tm, _round_up(T * k, 16)))
    tm_cands = [t for t in (1024, 768, 512, 384, 256, 192, 128, 96, 64, 48, 32, 16)
                if t <= tm_cap]
    th_cands = [t for t in (512, 256, 128) if H % t == 0]
    if not th_cands:
        th_cands = [H]
    for tm in tm_cands:
        for th in th_cands:
            if _vmem_tile_bytes(tm, th, D) <= vmem_budget:
                return tm, th
    return 16, th_cands[-1]


# ---------------------------------------------------------------------------
# One-time weight preparation (outside the per-forward path): fuse W1/W3 into
# one stacked bf16 tensor, pre-cast W2. Native torch layouts are kept.
# ---------------------------------------------------------------------------
def prepare_moe_weights(w1, w2, w3):
    """w1/w3: (E, H, D), w2: (E, D, H) f32 -> (w13 (E,2,H,D) bf16, w2 (E,D,H) bf16)."""
    w13 = jnp.stack([w1, w3], axis=1).astype(jnp.bfloat16)
    w2b = w2.astype(jnp.bfloat16)
    return w13, w2b


# ---------------------------------------------------------------------------
# Forward.
# ---------------------------------------------------------------------------
def moe_forward(x, gate_w, w13, w2, *, num_experts_per_tok=2, tm=None, th=None):
    """x: (B, S, D) f32. gate_w: (E, D) f32. w13/w2 from prepare_moe_weights.
    Returns (B*S, D) f32, matching the PyTorch MoE.forward."""
    B, S, D = x.shape
    T = B * S
    k = num_experts_per_tok
    E, two, H, _ = w13.shape
    assert two == 2

    # ---- VMEM-aware tile selection ----------------------------------------
    try:
        vmem_cap = int(pltpu.get_tpu_info().vmem_capacity_bytes)
    except Exception:
        vmem_cap = 64 * 1024 * 1024          # conservative (v7x per-TC)
    vmem_limit = int(min(vmem_cap * 3 // 4, 100 * 1024 * 1024))
    auto_tm, auto_th = _choose_tiles(T, D, H, E, k, int(vmem_limit * 0.8), vmem_cap)
    tm = auto_tm if tm is None else tm
    th = auto_th if th is None else th
    assert tm % 16 == 0, tm                                   # bf16 sublane pack (16,128)
    assert H % th == 0 and (th == H or th % 128 == 0), (H, th)

    xf = x.reshape(T, D)

    # ---- gating (tiny, f32) ------------------------------------------------
    scores = jnp.dot(xf, gate_w.T, precision=lax.Precision.HIGHEST)   # (T, E)
    topv, topi = lax.top_k(scores, k)                                 # (T, k)
    topw = jax.nn.softmax(topv, axis=-1)                              # (T, k)

    # ---- grouped-GEMM dispatch: sort expanded (token, slot) rows by expert --
    flat_e = topi.reshape(-1).astype(jnp.int32)                       # (T*k,)
    flat_w = topw.reshape(-1)                                         # (T*k,)
    order = jnp.argsort(flat_e)                                       # (T*k,)
    sort_e = flat_e[order]
    sort_w = flat_w[order]
    sort_t = (order // k).astype(jnp.int32)                           # original token id

    group_sizes = jnp.zeros((E,), jnp.int32).at[flat_e].add(1)        # (E,)
    csum = jnp.cumsum(group_sizes)
    group_starts = csum - group_sizes
    padded_sizes = ((group_sizes + tm - 1) // tm) * tm                # pad each group to tm
    pcsum = jnp.cumsum(padded_sizes)
    padded_starts = pcsum - padded_sizes
    total_padded = pcsum[-1]

    # Static padded row count (upper bound, multiple of tm).
    P = _round_up(T * k, tm) + E * tm
    G = P // tm

    r = jnp.arange(T * k, dtype=jnp.int32)
    dest = padded_starts[sort_e] + (r - group_starts[sort_e])         # unique positions < P

    pad_tok = jnp.zeros((P,), jnp.int32).at[dest].set(sort_t)
    pad_w = jnp.zeros((P,), jnp.float32).at[dest].set(sort_w)         # padding rows keep w=0

    x_sorted = xf.astype(jnp.bfloat16)[pad_tok]                       # (P, D) bf16 gather

    # Per-row-tile expert id + validity -> 1-D int32 SMEM scalar prefetch.
    tile_start = jnp.arange(G, dtype=jnp.int32) * tm
    tile_e_raw = jnp.searchsorted(pcsum, tile_start, side="right").astype(jnp.int32)
    tile_valid = (tile_start < total_padded).astype(jnp.int32)
    n_valid = jnp.maximum(total_padded // tm, 1)
    last_e = jnp.clip(tile_e_raw[n_valid - 1], 0, E - 1)
    # Invalid tail tiles point at the last real expert (and h index 0 below) so
    # their weight DMA collapses to an already-resident block; compute skipped.
    tile_e = jnp.where(tile_valid > 0, jnp.clip(tile_e_raw, 0, E - 1), last_e)

    grid = (G, H // th)

    cost = pl.CostEstimate(
        flops=int(6 * T * k * D * H),
        transcendentals=int(T * k * H),
        bytes_accessed=int(G * 3 * H * D * 2 + 2 * P * D * 2 + P * 4),
    )

    y_sorted = pl.pallas_call(
        _moe_gmm_kernel,
        out_shape=jax.ShapeDtypeStruct((P, D), jnp.bfloat16),
        grid_spec=pltpu.PrefetchScalarGridSpec(
            num_scalar_prefetch=2,            # tile_e, tile_valid -> SMEM
            grid=grid,
            in_specs=[
                pl.BlockSpec((tm, D), lambda g, h, te, tv: (g, 0)),        # sorted x (bf16)
                pl.BlockSpec((tm, 1), lambda g, h, te, tv: (g, 0)),        # combine weights
                pl.BlockSpec((1, 2, th, D),                                # fused W1/W3
                             lambda g, h, te, tv: (te[g], 0, h * tv[g], 0)),
                pl.BlockSpec((1, D, th),                                   # W2
                             lambda g, h, te, tv: (te[g], 0, h * tv[g])),
            ],
            out_specs=pl.BlockSpec((tm, D), lambda g, h, te, tv: (g, 0)),
            scratch_shapes=[pltpu.VMEM((tm, D), jnp.float32)],
        ),
        compiler_params=pltpu.CompilerParams(
            dimension_semantics=("parallel", "arbitrary"),
            vmem_limit_bytes=vmem_limit,
        ),
        cost_estimate=cost,
    )(tile_e, tile_valid, x_sorted, pad_w[:, None], w13, w2)

    # Combine: scatter-add the per-(token, slot) expert outputs back to tokens.
    # Padding rows carry weight 0 -> contribute exactly 0.
    out = jax.ops.segment_sum(y_sorted.astype(jnp.float32), pad_tok, num_segments=T)
    return out


# ---------------------------------------------------------------------------
# Pure-JAX reference reproducing the PyTorch gather-loop semantics.
# ---------------------------------------------------------------------------
def moe_reference(x, gate_w, w1, w2, w3, *, num_experts_per_tok=2, quantize=False):
    """quantize=True mirrors the kernel's bf16 rounding points."""
    B, S, D = x.shape
    E, H, _ = w1.shape
    T = B * S
    k = num_experts_per_tok
    xf = x.reshape(T, D)
    scores = jnp.dot(xf, gate_w.T, precision=lax.Precision.HIGHEST)
    topv, topi = lax.top_k(scores, k)
    topw = jax.nn.softmax(topv, axis=-1)

    def q(a):
        return a.astype(jnp.bfloat16).astype(jnp.float32) if quantize else a

    xq = q(xf)
    out = jnp.zeros((T, D), jnp.float32)
    for j in range(k):
        wj = topw[:, j]
        ys = []
        for e in range(E):
            h1 = xq @ q(w1[e]).T
            h3 = xq @ q(w3[e]).T
            act = h1 * jax.nn.sigmoid(h1) * h3
            y = q(wj[:, None] * act) @ q(w2[e]).T
            ys.append(q(y))
        ys = jnp.stack(ys, axis=1)                                     # (T, E, D)
        out = out + jnp.take_along_axis(ys, topi[:, j][:, None, None], axis=1)[:, 0]
    return out


if __name__ == "__main__":
    # Small shapes consistent with the module (d_model -> D, hidden_dim -> H,
    # num_experts=4, num_experts_per_tok=2).
    B, S, D = 2, 16, 64
    H = 256
    E = 4
    K = 2

    key = jax.random.PRNGKey(0)
    kx, kg, k1, k2, k3 = jax.random.split(key, 5)
    x = jax.random.normal(kx, (B, S, D), dtype=jnp.float32)
    gate_w = jax.random.normal(kg, (E, D), dtype=jnp.float32) * 0.05   # nn.Linear(dim, E).weight
    w1 = jax.random.normal(k1, (E, H, D), dtype=jnp.float32) * 0.05    # expert.w1.weight
    w2 = jax.random.normal(k2, (E, D, H), dtype=jnp.float32) * 0.05    # expert.w2.weight
    w3 = jax.random.normal(k3, (E, H, D), dtype=jnp.float32) * 0.05    # expert.w3.weight

    # One-time weight prep (bf16 cast + W1/W3 fusion) OUTSIDE the jitted forward.
    w13b, w2b = prepare_moe_weights(w1, w2, w3)

    # (a) auto (VMEM-aware) tile selection
    run_auto = jax.jit(functools.partial(moe_forward, num_experts_per_tok=K))
    out_auto = run_auto(x, gate_w, w13b, w2b)
    jax.block_until_ready(out_auto)

    # (b) explicit small tiles to exercise multiple row tiles and H-block accumulation
    run_tiled = jax.jit(functools.partial(moe_forward, num_experts_per_tok=K, tm=32, th=128))
    out_tiled = run_tiled(x, gate_w, w13b, w2b)
    jax.block_until_ready(out_tiled)

    ref_q = moe_reference(x, gate_w, w1, w2, w3, num_experts_per_tok=K, quantize=True)
    ref_f = moe_reference(x, gate_w, w1, w2, w3, num_experts_per_tok=K, quantize=False)

    for out in (out_auto, out_tiled):
        assert out.shape == (B * S, D), out.shape
        # Tight check against the bf16-quantized reference (kernel numerics).
        assert jnp.allclose(out, ref_q, atol=3e-3, rtol=3e-2), \
            float(jnp.max(jnp.abs(out - ref_q)))
        # Looser check against full-f32 module semantics (bf16 rounding).
        assert jnp.allclose(out, ref_f, atol=2e-2, rtol=1e-1), \
            float(jnp.max(jnp.abs(out - ref_f)))

    print("KERNEL_OK")
</pallas_src>

<mosaic_0001>
module attributes {stable_mosaic.version = 11 : i64} {
  func.func private @main(%arg0: i32) attributes {dimension_semantics = [#tpu.dimension_semantics<core_parallel>], iteration_bounds = array<i64: 2>, tpu.core_type = #tpu.core_type<sc_scalar_subcore>, window_params = []} {
    return
  }
}

module attributes {stable_mosaic.version = 11 : i64} {
  func.func private @main(%arg0: i32) attributes {dimension_semantics = [#tpu.dimension_semantics<core_parallel>], iteration_bounds = array<i64: 2>, tpu.core_type = #tpu.core_type<sc_scalar_subcore>, window_params = []} {
    return
  }
}

module attributes {stable_mosaic.version = 11 : i64} {
  func.func @_moe_gmm_kernel(%arg0: i32, %arg1: i32, %arg2: memref<5xi32, #tpu.memory_space<smem>>, %arg3: memref<5xi32, #tpu.memory_space<smem>>, %arg4: memref<64x64xbf16, #tpu.memory_space<vmem>>, %arg5: memref<64x1xf32, #tpu.memory_space<vmem>>, %arg6: memref<1x2x256x64xbf16, #tpu.memory_space<vmem>>, %arg7: memref<1x64x256xbf16, #tpu.memory_space<vmem>>, %arg8: memref<64x64xbf16, #tpu.memory_space<vmem>>, %arg9: memref<64x64xf32, #tpu.memory_space<vmem>>) attributes {dimension_semantics = [#tpu.dimension_semantics<parallel>, #tpu.dimension_semantics<arbitrary>], iteration_bounds = array<i64: 5, 1>, scalar_prefetch = 2 : i64, scratch_operands = 1 : i64, tpu.core_type = #tpu.core_type<tc>, window_params = [{transform_indices = @transform_0, window_bounds = array<i64: 64, 64>}, {transform_indices = @transform_1, window_bounds = array<i64: 64, 1>}, {transform_indices = @transform_2, window_bounds = array<i64: 1, 2, 256, 64>}, {transform_indices = @transform_3, window_bounds = array<i64: 1, 64, 256>}, {transform_indices = @transform_4, window_bounds = array<i64: 64, 64>}]} {
    %c0_i32 = arith.constant 0 : i32
    %0 = arith.cmpi eq, %arg1, %c0_i32 : i32
    %1 = arith.extui %0 : i1 to i32
    %c0_i32_0 = arith.constant 0 : i32
    %2 = arith.cmpi ne, %1, %c0_i32_0 : i32
    scf.if %2 {
      %cst = arith.constant 0.000000e+00 : f32
      %11 = vector.broadcast %cst : f32 to vector<64x64xf32>
      %c0 = arith.constant 0 : index
      %c0_5 = arith.constant 0 : index
      %12 = vector.load %arg9[%c0, %c0_5] : memref<64x64xf32, #tpu.memory_space<vmem>>, vector<64x64xf32>
      tpu.vector_store %arg9[%c0, %c0_5], %11 {strides = array<i32>} : memref<64x64xf32, #tpu.memory_space<vmem>>, vector<64x64xf32>,
    } else {
    }
    %3 = arith.index_cast %arg0 : i32 to index
    %4 = memref.load %arg3[%3] : memref<5xi32, #tpu.memory_space<smem>>
    %c0_i32_1 = arith.constant 0 : i32
    %5 = arith.cmpi sgt, %4, %c0_i32_1 : i32
    %6 = arith.extui %5 : i1 to i32
    %c0_i32_2 = arith.constant 0 : i32
    %7 = arith.cmpi ne, %6, %c0_i32_2 : i32
    scf.if %7 {
      %c0 = arith.constant 0 : index
      %c0_5 = arith.constant 0 : index
      %11 = vector.load %arg4[%c0, %c0_5] : memref<64x64xbf16, #tpu.memory_space<vmem>>, vector<64x64xbf16>
      %c0_6 = arith.constant 0 : index
      %c0_7 = arith.constant 0 : index
      %c0_8 = arith.constant 0 : index
      %c0_9 = arith.constant 0 : index
      %12 = vector.load %arg6[%c0_6, %c0_7, %c0_8, %c0_9] : memref<1x2x256x64xbf16, #tpu.memory_space<vmem>>, vector<1x1x256x64xbf16>
      %13 = vector.shape_cast %12 : vector<1x1x256x64xbf16> to vector<256x64xbf16>
      %c0_10 = arith.constant 0 : index
      %c1 = arith.constant 1 : index
      %c0_11 = arith.constant 0 : index
      %c0_12 = arith.constant 0 : index
      %14 = vector.load %arg6[%c0_10, %c1, %c0_11, %c0_12] : memref<1x2x256x64xbf16, #tpu.memory_space<vmem>>, vector<1x1x256x64xbf16>
      %15 = vector.shape_cast %14 : vector<1x1x256x64xbf16> to vector<256x64xbf16>
      %c0_13 = arith.constant 0 : index
      %c0_14 = arith.constant 0 : index
      %c0_15 = arith.constant 0 : index
      %16 = vector.load %arg7[%c0_13, %c0_14, %c0_15] : memref<1x64x256xbf16, #tpu.memory_space<vmem>>, vector<1x64x256xbf16>
      %17 = vector.shape_cast %16 : vector<1x64x256xbf16> to vector<64x256xbf16>
      %cst = arith.constant dense<0.000000e+00> : vector<64x256xf32>
      %18 = tpu.matmul %11, %13, %cst {dimension_numbers = #tpu.dot_dimension_numbers<[1], [1], [0], [0], [0, 0, 1, 0], [], []>} : vector<64x64xbf16>, vector<256x64xbf16>, vector<64x256xf32> -> vector<64x256xf32>
      %cst_16 = arith.constant dense<0.000000e+00> : vector<64x256xf32>
      %19 = tpu.matmul %11, %15, %cst_16 {dimension_numbers = #tpu.dot_dimension_numbers<[1], [1], [0], [0], [0, 0, 1, 0], [], []>} : vector<64x64xbf16>, vector<256x64xbf16>, vector<64x256xf32> -> vector<64x256xf32>
      %20 = arith.negf %18 : vector<64x256xf32>
      %21 = math.exp %20 : vector<64x256xf32>
      %cst_17 = arith.constant 1.000000e+00 : f32
      %22 = vector.broadcast %cst_17 : f32 to vector<64x256xf32>
      %23 = arith.addf %22, %21 : vector<64x256xf32>
      %24 = arith.divf %22, %23 : vector<64x256xf32>
      %25 = arith.mulf %18, %24 : vector<64x256xf32>
      %26 = arith.mulf %25, %19 : vector<64x256xf32>
      %c0_18 = arith.constant 0 : index
      %c0_19 = arith.constant 0 : index
      %27 = vector.load %arg5[%c0_18, %c0_19] : memref<64x1xf32, #tpu.memory_space<vmem>>, vector<64x1xf32>
      %28 = vector.broadcast %27 : vector<64x1xf32> to vector<64x256xf32>
      %29 = arith.mulf %28, %26 : vector<64x256xf32>
      %30 = arith.truncf %29 : vector<64x256xf32> to vector<64x256xbf16>
      %c0_20 = arith.constant 0 : index
      %c0_21 = arith.constant 0 : index
      %31 = vector.load %arg9[%c0_20, %c0_21] : memref<64x64xf32, #tpu.memory_space<vmem>>, vector<64x64xf32>
      %cst_22 = arith.constant dense<0.000000e+00> : vector<64x64xf32>
      %32 = tpu.matmul %30, %17, %cst_22 {dimension_numbers = #tpu.dot_dimension_numbers<[1], [1], [0], [0], [0, 0, 1, 0], [], []>} : vector<64x256xbf16>, vector<64x256xbf16>, vector<64x64xf32> -> vector<64x64xf32>
      %33 = arith.addf %31, %32 : vector<64x64xf32>
      %c0_23 = arith.constant 0 : index
      %c0_24 = arith.constant 0 : index
      %34 = vector.load %arg9[%c0_23, %c0_24] : memref<64x64xf32, #tpu.memory_space<vmem>>, vector<64x64xf32>
      tpu.vector_store %arg9[%c0_23, %c0_24], %33 {strides = array<i32>} : memref<64x64xf32, #tpu.memory_space<vmem>>, vector<64x64xf32>,
    } else {
    }
    %c0_i32_3 = arith.constant 0 : i32
    %8 = arith.cmpi eq, %arg1, %c0_i32_3 : i32
    %9 = arith.extui %8 : i1 to i32
    %c0_i32_4 = arith.constant 0 : i32
    %10 = arith.cmpi ne, %9, %c0_i32_4 : i32
    scf.if %10 {
      %c0 = arith.constant 0 : index
      %c0_5 = arith.constant 0 : index
      %11 = vector.load %arg9[%c0, %c0_5] : memref<64x64xf32, #tpu.memory_space<vmem>>, vector<64x64xf32>
      %12 = arith.truncf %11 : vector<64x64xf32> to vector<64x64xbf16>
      %c0_6 = arith.constant 0 : index
      %c0_7 = arith.constant 0 : index
      %13 = vector.load %arg8[%c0_6, %c0_7] : memref<64x64xbf16, #tpu.memory_space<vmem>>, vector<64x64xbf16>
      tpu.vector_store %arg8[%c0_6, %c0_7], %12 {strides = array<i32>} : memref<64x64xbf16, #tpu.memory_space<vmem>>, vector<64x64xbf16>,
    } else {
    }
    return
  }
  func.func @transform_0(%arg0: i32, %arg1: i32, %arg2: memref<5xi32, #tpu.memory_space<smem>>, %arg3: memref<5xi32, #tpu.memory_space<smem>>) -> (i32, i32) {
    %c0_i32 = arith.constant 0 : i32
    %c0_i32_0 = arith.constant 0 : i32
    return %arg0, %c0_i32 : i32, i32
  }
  func.func @transform_1(%arg0: i32, %arg1: i32, %arg2: memref<5xi32, #tpu.memory_space<smem>>, %arg3: memref<5xi32, #tpu.memory_space<smem>>) -> (i32, i32) {
    %c0_i32 = arith.constant 0 : i32
    %c0_i32_0 = arith.constant 0 : i32
    return %arg0, %c0_i32 : i32, i32
  }
  func.func @transform_2(%arg0: i32, %arg1: i32, %arg2: memref<5xi32, #tpu.memory_space<smem>>, %arg3: memref<5xi32, #tpu.memory_space<smem>>) -> (i32, i32, i32, i32) {
    %0 = arith.index_cast %arg0 : i32 to index
    %1 = memref.load %arg2[%0] : memref<5xi32, #tpu.memory_space<smem>>
    %2 = arith.index_cast %arg0 : i32 to index
    %3 = memref.load %arg3[%2] : memref<5xi32, #tpu.memory_space<smem>>
    %4 = arith.muli %arg1, %3 : i32
    %c0_i32 = arith.constant 0 : i32
    %c0_i32_0 = arith.constant 0 : i32
    %c0_i32_1 = arith.constant 0 : i32
    return %1, %c0_i32, %4, %c0_i32_0 : i32, i32, i32, i32
  }
  func.func @transform_3(%arg0: i32, %arg1: i32, %arg2: memref<5xi32, #tpu.memory_space<smem>>, %arg3: memref<5xi32, #tpu.memory_space<smem>>) -> (i32, i32, i32) {
    %0 = arith.index_cast %arg0 : i32 to index
    %1 = memref.load %arg2[%0] : memref<5xi32, #tpu.memory_space<smem>>
    %2 = arith.index_cast %arg0 : i32 to index
    %3 = memref.load %arg3[%2] : memref<5xi32, #tpu.memory_space<smem>>
    %4 = arith.muli %arg1, %3 : i32
    %c0_i32 = arith.constant 0 : i32
    %c0_i32_0 = arith.constant 0 : i32
    return %1, %c0_i32, %4 : i32, i32, i32
  }
  func.func @transform_4(%arg0: i32, %arg1: i32, %arg2: memref<5xi32, #tpu.memory_space<smem>>, %arg3: memref<5xi32, #tpu.memory_space<smem>>) -> (i32, i32) {
    %c0_i32 = arith.constant 0 : i32
    %c0_i32_0 = arith.constant 0 : i32
    return %arg0, %c0_i32 : i32, i32
  }
}

</mosaic_0001>

<bundles_post_ra>
// kernel: custom-call.1
= control target key start
LH: loop header
LB: loop body
LE: loop exit
PB: predicated region body
PF: predicated region fallthrough
CT: control target
= control target key end

     0   :  { %s6_s0 = inlined_call_operand.vmem [shape: u32[5], index: 0, kind: output, shape index: {}]  }

// kernel: moe_forward.1
= control target key start
LH: loop header
LB: loop body
LE: loop exit
PB: predicated region body
PF: predicated region fallthrough
CT: control target
= control target key end

     0   :  { %s2145_s0 = inlined_call_operand.vmem [shape: s32[5], index: 0, kind: input, shape index: {}]   ;;  %s2146_s2 = inlined_call_operand.vmem [shape: bf16[320,64], index: 2, kind: input, shape index: {}]   ;;  %s2147_s3 = inlined_call_operand.vmem [shape: f32[320,1], index: 3, kind: input, shape index: {}]   ;;  %s2148_s4 = inlined_call_operand.vmem [shape: bf16[4,2,256,64], index: 4, kind: input, shape index: {}]   ;;  %s2149_s5 = inlined_call_operand.vmem [shape: bf16[4,64,256], index: 5, kind: input, shape index: {}]   ;;  %s2150_s6 = inlined_call_operand.vmem [shape: bf16[320,64], index: 6, kind: output, shape index: {}]   ;;  %s2151_s1 = inlined_call_operand.vmem [shape: s32[5], index: 1, kind: input, shape index: {}]  }
   0x1   :  { %s11_s23 = sshll.u32 %s2145_s0, 4  ;;  %s15_s26 = sshll.u32 %s2151_s1, 4  ;;  %s12_s23 = int_to_ptr.vmem [resolvable:$true] %s11_s23  ;;  %s16_s26 = int_to_ptr.vmem [resolvable:$true] %s15_s26 }
   0x2   :  { %s1740_s27 = scalar_lea.vmem %s12_s23, 16  ;;  %p1745_p1 = scmp.lt.s32.totalorder %s12_s23, %s12_s23 }
   0x3   :  { %p1741_p0 = scmp.ne.s32.totalorder %s12_s23, %s1740_s27  ;;  %p1746_p2 = scmp.lt.s32.totalorder %s1740_s27, %s1740_s27 }
   0x5   :  { %p1747_p3 = por %p1746_p2, %p1745_p1 }
   0x7   :  { %p1748_p4 = pnand %p1747_p3, %p1741_p0 }
   0x9   :  { %1751 = shalt.err (!%p1748_p4)  }
   0xa   :  { %s1790_s28 = smov [#allocation4]   ;;  %s1752_s29 = scalar_lea.vmem %s16_s26, 16 }
   0xb   :  { %14 = dma.vmem_to_smem %s12_s23, 16, %s1790_s28, [#allocation3] }
   0xc   :  { %p1753_p5 = scmp.ne.s32.totalorder %s16_s26, %s1752_s29  ;;  %p1757_p6 = scmp.lt.s32.totalorder %s16_s26, %s16_s26 }
   0xd   :  { %p1758_p7 = scmp.lt.s32.totalorder %s1752_s29, %s1752_s29 }
   0xf   :  { %p1759_p8 = por %p1758_p7, %p1757_p6 }
  0x11   :  { %p1760_p9 = pnand %p1759_p8, %p1753_p5 }
  0x13   :  { %1763 = shalt.err (!%p1760_p9)  }
  0x14   :  { %s1791_s0 = smov [#allocation5]  }
  0x15   :  { %18 = dma.vmem_to_smem %s16_s26, 16, %s1791_s0, [#allocation3] }
  0x16   :  { %1776 = dma.done.wait [#allocation3], 32 }
  0x17   :  { %1777 = vsyncadd [#allocation3], 4294967264 }
  0x18   :  { %20 = sfence }
  0x19   :  { %s1835_s1 = smov 0   ;;  %s1837_s30 = smov 0  }
  0x1a   :  { %s1839_s7 = smov 0  }
  0x1b LB: > { %s38_s8 = sadd.s32 1, %s1784_s30  ;;  %p1394_p10 = scmp.ge.s32.totalorder %s1788_s7, 1  ;;  %s1788_s7 = sphi %s1839_s7, %s26_s7   ;;  %s1784_s30 = sphi %s1837_s30, %s2153_s30   ;;  %s1780_s1 = sphi %s1835_s1, %s2152_s1  }
  0x1c   : > { %p40_p11 = scmp.ge.s32.totalorder %s38_s8, 5  ;;  %p256_p12 = scmp.lt.s32.totalorder %s1788_s7, 6 }
  0x1e   : > { %s2155_s8 = smov (%p40_p11, %s38_s8), 0  ;;  %p257_p13 = pnand %p1394_p10, %p256_p12 }
  0x1f   : > { %s1395_s9 = sshll.u32 (!%p257_p13), %s1780_s1, 3  ;;  %s323_s10 = sld [smem:[#allocation4 + %s1780_s1]] (!%p257_p13)  ;;  %vm366_vm0 = vcmask (!%p257_p13), 523264   ;;  %v1792_v0 = vmov (!%p257_p13), 0.0  }
  0x20   : > { %260 = sbr.rel (%p257_p13) target bundleno = 614 (0x266), region = 36  ;;  %p312_p0 = scmp.lt.s32.totalorder (!%p257_p13), %s1395_s9, 39  ;;  %367 = vst.msk [vmem:[#allocation2] sm:$0xff] (!%p257_p13), %vm366_vm0, %v1792_v0  ;;  %368 = vst.msk [vmem:[#allocation2 + $0x8] sm:$0xff] (!%p257_p13), %vm366_vm0, %v1792_v0 }
  0x21   : > { %s339_s11 = sld [smem:[#allocation4 + %s1780_s1]] (!%p257_p13)  ;;  %369 = vst.msk [vmem:[#allocation2 + $0x10] sm:$0xff] (!%p257_p13), %vm366_vm0, %v1792_v0  ;;  %370 = vst.msk [vmem:[#allocation2 + $0x18] sm:$0xff] (!%p257_p13), %vm366_vm0, %v1792_v0 }
  0x22   : > { %371 = vst.msk [vmem:[#allocation2 + $0x20] sm:$0xff] (!%p257_p13), %vm366_vm0, %v1792_v0  ;;  %372 = vst.msk [vmem:[#allocation2 + $0x28] sm:$0xff] (!%p257_p13), %vm366_vm0, %v1792_v0  ;;  %s375_s12 = sld [smem:[#allocation5 + %s1780_s1]] (!%p257_p13) }
  0x23   : > { %373 = vst.msk [vmem:[#allocation2 + $0x30] sm:$0xff] (!%p257_p13), %vm366_vm0, %v1792_v0  ;;  %374 = vst.msk [vmem:[#allocation2 + $0x38] sm:$0xff] (!%p257_p13), %vm366_vm0, %v1792_v0 }
  0x25   : > { %p327_p1 = scmp.lt.s32.totalorder (!%p257_p13), %s323_s10, 3 }
  0x27   : > { %s2157_s9 = smov (!%p312_p0, %s1395_s9), 39  ;;  %p343_p2 = scmp.lt.s32.totalorder %s339_s11, 3 }
  0x28   : > { %s1396_s13 = sshll.u32 %s2157_s9, 2  ;;  %s1398_s14 = sshll.u32 %s2157_s9, 3 }
  0x29   : > { %s1864_s17 = scalar_lea.vmem %s2146_s2, %s1396_s13  ;;  %s1869_s20 = scalar_lea.vmem %s2147_s3, %s1398_s14 }
  0x2a   : > { %s1874_s23 = scalar_lea.vmem %s2150_s6, %s1396_s13  ;;  %s2159_s10 = smov (!%p327_p1, %s323_s10), 3 }
  0x2b   : > { %s2161_s11 = smov (!%p343_p2, %s339_s11), 3  ;;  %s1516_s24 = sshll.u32 %s2159_s10, 8 }
  0x2c   : > { %s1879_s27 = scalar_lea.vmem %s2148_s4, %s1516_s24  ;;  %s1517_s28 = sshll.u32 %s2161_s11, 6 }
  0x2d   : > { %s1884_s1 = scalar_lea.vmem %s2149_s5, %s1517_s28  ;;  %p1405_p3 = scmp.le.s32.totalorder %s375_s12, 0 }
  0x2e   : > { %v1628_v1 = vld [vmem:[%s1879_s27 + $0x40] sm:$0xff] (!%p1405_p3)   ;;  %v1793_v3 = vmov (!%p1405_p3), 0   ;;  %v1630_v4 = vld [vmem:[%s1879_s27 + $0x48] sm:$0xff] (!%p1405_p3)   ;;  %v1632_v7 = vld [vmem:[%s1879_s27 + $0x50] sm:$0xff] (!%p1405_p3)  }
  0x2f   : > { %379 = sbr.rel (%p1405_p3) target bundleno = 604 (0x25c), region = 44  ;;  %v1629_v2 = vld [vmem:[%s1879_s27] sm:$0xff] (!%p1405_p3)   ;;  %1626 = vset.pattern.permute.xlu0 (!%p1405_p3), %v1793_v3  ;;  %1627 = vset.pattern.permute.xlu1 (!%p1405_p3), %v1793_v3  ;;  %v1631_v6 = vld [vmem:[%s1879_s27 + $0x8] sm:$0xff] (!%p1405_p3)   ;;  %v1633_v11 = vld [vmem:[%s1879_s27 + $0x10] sm:$0xff] (!%p1405_p3)  }
  0x30   : > { %1582 = vmatprep.subr.msk.bf16.mxu0 (!%p1405_p3), %vm366_vm0, %v1628_v1  ;;  %v575_v5 = vsel (!%p1405_p3), %vm366_vm0, %v1629_v2, 0  ;;  %v1636_v8 = vld [vmem:[%s1879_s27 + $0xc0] sm:$0xff] (!%p1405_p3)   ;;  %v578_v9 = vsel (!%p1405_p3), %vm366_vm0, %v1631_v6, 0  ;;  %v1640_v13 = vld [vmem:[%s1879_s27 + $0xc8] sm:$0xff] (!%p1405_p3)   ;;  %v581_v15 = vsel (!%p1405_p3), %vm366_vm0, %v1633_v11, 0  ;;  %v1634_v16 = vld [vmem:[%s1879_s27 + $0x58] sm:$0xff] (!%p1405_p3)  }
  0x31   : > { %1527 = vmatpush3.bf16.xpose.msra.mxu0 (!%p1405_p3), %v575_v5  ;;  %v1637_v10 = vld [vmem:[%s1879_s27 + $0x80] sm:$0xff] (!%p1405_p3)   ;;  %1590 = vmatprep.subr.msk.bf16.mxu1 (!%p1405_p3), %vm366_vm0, %v1636_v8  ;;  %v1641_v14 = vld [vmem:[%s1879_s27 + $0x88] sm:$0xff] (!%p1405_p3)   ;;  %v1644_v18 = vld [vmem:[%s1879_s27 + $0xd0] sm:$0xff] (!%p1405_p3)  }
  0x32   : > { %1583 = vmatprep.subr.msk.bf16.mxu0 (!%p1405_p3), %vm366_vm0, %v1630_v4  ;;  %v776_v12 = vsel (!%p1405_p3), %vm366_vm0, %v1637_v10, 0  ;;  %v779_v17 = vsel (!%p1405_p3), %vm366_vm0, %v1641_v14, 0  ;;  %v1635_v19 = vld [vmem:[%s1879_s27 + $0x18] sm:$0xff] (!%p1405_p3)   ;;  %v1645_v20 = vld [vmem:[%s1879_s27 + $0x90] sm:$0xff] (!%p1405_p3)   ;;  %v1638_v22 = vld [vmem:[%s1879_s27 + $0x60] sm:$0xff] (!%p1405_p3)  }
  0x33   : > { %1551 = vmatpush3.bf16.xpose.msra.mxu1 (!%p1405_p3), %v776_v12  ;;  %v584_v21 = vsel (!%p1405_p3), %vm366_vm0, %v1635_v19, 0  ;;  %v782_v23 = vsel (!%p1405_p3), %vm366_vm0, %v1645_v20, 0  ;;  %v1648_v24 = vld [vmem:[%s1879_s27 + $0xd8] sm:$0xff] (!%p1405_p3)   ;;  %v1917_v25 = vld [vmem:[%s1864_s17] sm:$0xff] (!%p1405_p3)   ;;  %v1642_v29 = vld [vmem:[%s1879_s27 + $0x68] sm:$0xff] (!%p1405_p3)  }
  0x34   : > { %1591 = vmatprep.subr.msk.bf16.mxu1 (!%p1405_p3), %vm366_vm0, %v1640_v13  ;;  %v1639_v26 = vld [vmem:[%s1879_s27 + $0x20] sm:$0xff] (!%p1405_p3)   ;;  %v1649_v27 = vld [vmem:[%s1879_s27 + $0x98] sm:$0xff] (!%p1405_p3)   ;;  %1542 = vmatprep.mubr.msk.bf16.mxu0 (!%p1405_p3), %vm366_vm0, %v1917_v25  ;;  %v1643_v34 = vld [vmem:[%s1879_s27 + $0x28] sm:$0xff] (!%p1405_p3)  }
  0x35   : > { %1566 = vmatprep.mubr.msk.bf16.mxu1 (!%p1405_p3), %vm366_vm0, %v1917_v25  ;;  %v587_v28 = vsel (!%p1405_p3), %vm366_vm0, %v1639_v26, 0  ;;  %v785_v30 = vsel (!%p1405_p3), %vm366_vm0, %v1649_v27, 0  ;;  %v1652_v31 = vld [vmem:[%s1879_s27 + $0xe0] sm:$0xff] (!%p1405_p3)   ;;  %v1025_v36 = vld [vmem:[%s1869_s20 + $0x8] sm:$0xff] (!%p1405_p3)  ;;  %v590_v38 = vsel (!%p1405_p3), %vm366_vm0, %v1643_v34, 0  ;;  %v1646_v39 = vld [vmem:[%s1879_s27 + $0x70] sm:$0xff] (!%p1405_p3)  }
  0x36   : > { %v1024_v32 = vld [vmem:[%s1869_s20] sm:$0xff]  ;;  %v1029_v37 = vld [vmem:[%s1869_s20 + $0x28] sm:$0xff]  ;;  %v1026_v42 = vld [vmem:[%s1869_s20 + $0x10] sm:$0xff] }
  0x37   : > { %v1028_v33 = vld [vmem:[%s1869_s20 + $0x20] sm:$0xff]  ;;  %1034 = vperm.xlu0 %1626, %v1024_v32   ;;  %v1655_v41 = vld [vmem:[%s1879_s27 + $0xe8] sm:$0xff]   ;;  %v1027_v43 = vld [vmem:[%s1869_s20 + $0x18] sm:$0xff] }
  0x38   : > { %v1653_v35 = vld [vmem:[%s1879_s27 + $0xa0] sm:$0xff]   ;;  %1054 = vperm.xlu1 %1627, %v1028_v33   ;;  %v1647_v44 = vld [vmem:[%s1879_s27 + $0x30] sm:$0xff]   ;;  %v1656_v45 = vld [vmem:[%s1879_s27 + $0xa8] sm:$0xff]  }
  0x39   : > { %1529 = vmatpush3.bf16.xpose.msra.mxu0 %v578_v9  ;;  %v788_v40 = vsel %vm366_vm0, %v1653_v35, 0  ;;  %v1031_v46 = vld [vmem:[%s1869_s20 + $0x38] sm:$0xff]  ;;  %v1030_v47 = vld [vmem:[%s1869_s20 + $0x30] sm:$0xff]  ;;  %v593_v48 = vsel %vm366_vm0, %v1647_v44, 0  ;;  %v791_v50 = vsel %vm366_vm0, %v1656_v45, 0  ;;  %v1657_v58 = vld [vmem:[%s1864_s17 + $0x8] sm:$0xff]  }
  0x3a   : > { %1584 = vmatprep.subr.msk.bf16.mxu0 %vm366_vm0, %v1632_v7  ;;  %v1650_v49 = vld [vmem:[%s1879_s27 + $0x78] sm:$0xff]   ;;  %v1658_v51 = vld [vmem:[%s1879_s27 + $0xf0] sm:$0xff]   ;;  %v1666_v62 = vld [vmem:[%s1884_s1 + $0x4] ss:$8 sps:$4 sm:$0xff]  }
  0x3b   : > { %1553 = vmatpush3.bf16.xpose.msra.mxu1 %v779_v17  ;;  %1039 = vperm.xlu0 %1626, %v1025_v36   ;;  %v1651_v52 = vld [vmem:[%s1879_s27 + $0x38] sm:$0xff]   ;;  %v1659_v53 = vld [vmem:[%s1879_s27 + $0xb0] sm:$0xff]   ;;  %v1664_v63 = vld [vmem:[%s1884_s1] ss:$8 sps:$4 sm:$0xff]  }
  0x3c   : > { %1592 = vmatprep.subr.msk.bf16.mxu1 %vm366_vm0, %v1644_v18  ;;  %1059 = vperm.xlu1 %1627, %v1029_v37   ;;  %v596_v54 = vsel %vm366_vm0, %v1651_v52, 0  ;;  %v794_v55 = vsel %vm366_vm0, %v1659_v53, 0  ;;  %v1661_v56 = vld [vmem:[%s1879_s27 + $0xf8] sm:$0xff]   ;;  %v1660_v60 = vld [vmem:[%s1864_s17 + $0x10] sm:$0xff]   ;;  %v1672_v2 = vld [vmem:[%s1884_s1 + $0x24] ss:$8 sps:$4 sm:$0xff]  }
  0x3d   : > { %v1662_v57 = vld [vmem:[%s1879_s27 + $0xb8] sm:$0xff]   ;;  %v1670_v3 = vld [vmem:[%s1884_s1 + $0x20] ss:$8 sps:$4 sm:$0xff]  }
  0x3e   : > { %v797_v59 = vsel %vm366_vm0, %v1662_v57, 0  ;;  %v1663_v61 = vld [vmem:[%s1864_s17 + $0x18] sm:$0xff]  }
  0x3f   : > { %1044 = vperm.xlu0 %1626, %v1026_v42   ;;  %v1669_v0 = vld [vmem:[%s1884_s1 + $0x14] ss:$8 sps:$4 sm:$0xff]   ;;  %v1667_v1 = vld [vmem:[%s1884_s1 + $0x10] ss:$8 sps:$4 sm:$0xff]  }
  0x40   : > { %1049 = vperm.xlu1 %1627, %v1027_v43   ;;  %v1675_v4 = vld [vmem:[%s1884_s1 + $0x34] ss:$8 sps:$4 sm:$0xff]   ;;  %v1673_v5 = vld [vmem:[%s1884_s1 + $0x30] ss:$8 sps:$4 sm:$0xff]  }
  0x41   : > { %1531 = vmatpush3.bf16.xpose.msra.mxu0 %v581_v15 }
  0x42   : > { %1585 = vmatprep.subr.msk.bf16.mxu0 %vm366_vm0, %v1634_v16 }
  0x43   : > { %1555 = vmatpush3.bf16.xpose.msra.mxu1 %v782_v23  ;;  %1064 = vperm.xlu0 %1626, %v1030_v47  }
  0x44   : > { %1593 = vmatprep.subr.msk.bf16.mxu1 %vm366_vm0, %v1648_v24  ;;  %1069 = vperm.xlu1 %1627, %v1031_v46  }
  0x49   : > { %1533 = vmatpush3.bf16.xpose.msra.mxu0 %v584_v21 }
  0x4a   : > { %1586 = vmatprep.subr.msk.bf16.mxu0 %vm366_vm0, %v1638_v22 }
  0x4b   : > { %1557 = vmatpush3.bf16.xpose.msra.mxu1 %v785_v30 }
  0x4c   : > { %1594 = vmatprep.subr.msk.bf16.mxu1 %vm366_vm0, %v1652_v31 }
  0x51   : > { %1535 = vmatpush3.bf16.xpose.msra.mxu0 %v587_v28 }
  0x52   : > { %1587 = vmatprep.subr.msk.bf16.mxu0 %vm366_vm0, %v1642_v29 }
  0x53   : > { %1559 = vmatpush3.bf16.xpose.msra.mxu1 %v788_v40 }
  0x54   : > { %1595 = vmatprep.subr.msk.bf16.mxu1 %vm366_vm0, %v1655_v41 }
  0x59   : > { %1537 = vmatpush3.bf16.xpose.msra.mxu0 %v590_v38 }
  0x5a   : > { %1588 = vmatprep.subr.msk.bf16.mxu0 %vm366_vm0, %v1646_v39 }
  0x5b   : > { %1561 = vmatpush3.bf16.xpose.msra.mxu1 %v791_v50 }
  0x5c   : > { %1596 = vmatprep.subr.msk.bf16.mxu1 %vm366_vm0, %v1658_v51 }
  0x61   : > { %1539 = vmatpush3.bf16.xpose.msra.mxu0 %v593_v48 }
  0x62   : > { %1589 = vmatprep.subr.msk.bf16.mxu0 %vm366_vm0, %v1650_v49 }
  0x63   : > { %1563 = vmatpush3.bf16.xpose.msra.mxu1 %v794_v55 }
  0x64   : > { %1597 = vmatprep.subr.msk.bf16.mxu1 %vm366_vm0, %v1661_v56 }
  0x69   : > { %1541 = vmatpush3.bf16.xpose.msra.mxu0 %v596_v54 }
  0x6a   : > { %1144 = vmatprep.subr.bf16.mxu0 %v1666_v62 }
  0x6b   : > { %1565 = vmatpush3.bf16.xpose.msra.mxu1 %v797_v59 }
  0x6c   : > { %1574 = vmatprep.subr.bf16.mxu1 %v1666_v62 }
  0x70   : > { %1543 = vmatmul.mubr.msk.bf16.vlgmr.msra.gmra.mrb[0].mxu0 %vm366_vm0, %v1917_v25 }
  0x71   : > { %1544 = vmatprep.mubr.msk.bf16.mxu0 %vm366_vm0, %v1657_v58  ;;  %1145 = vmatpush1.bf16.xpose.msra.mxu0 %v1664_v63 }
  0x72   : > { %1567 = vmatmul.mubr.msk.bf16.vlgmr.msra.gmra.mrb[0].mxu1 %vm366_vm0, %v1917_v25  ;;  %1146 = vmatprep.subr.bf16.mxu0 %v1669_v0 }
  0x73   : > { %1568 = vmatprep.mubr.msk.bf16.mxu1 %vm366_vm0, %v1657_v58  ;;  %1578 = vmatpush1.bf16.xpose.msra.mxu1 %v1664_v63 }
  0x74   : > { %1575 = vmatprep.subr.bf16.mxu1 %v1669_v0 }
  0x78   : > { %1545 = vmatmul.mubr.msk.bf16.gmra.mrb[4].mxu0 %vm366_vm0, %v1657_v58 }
  0x79   : > { %1546 = vmatprep.mubr.msk.bf16.mxu0 %vm366_vm0, %v1660_v60  ;;  %1147 = vmatpush1.bf16.xpose.msra.mxu0 %v1667_v1 }
  0x7a   : > { %1569 = vmatmul.mubr.msk.bf16.gmra.mrb[4].mxu1 %vm366_vm0, %v1657_v58  ;;  %1148 = vmatprep.subr.bf16.mxu0 %v1672_v2 }
  0x7b   : > { %1570 = vmatprep.mubr.msk.bf16.mxu1 %vm366_vm0, %v1660_v60  ;;  %1579 = vmatpush1.bf16.xpose.msra.mxu1 %v1667_v1 }
  0x7c   : > { %1576 = vmatprep.subr.bf16.mxu1 %v1672_v2 }
  0x80   : > { %1547 = vmatmul.mubr.msk.bf16.gmra.mrb[8].mxu0 %vm366_vm0, %v1660_v60 }
  0x81   : > { %1548 = vmatprep.mubr.msk.bf16.mxu0 %vm366_vm0, %v1663_v61  ;;  %1149 = vmatpush1.bf16.xpose.msra.mxu0 %v1670_v3 }
  0x82   : > { %1571 = vmatmul.mubr.msk.bf16.gmra.mrb[8].mxu1 %vm366_vm0, %v1660_v60  ;;  %1150 = vmatprep.subr.bf16.mxu0 %v1675_v4 }
  0x83   : > { %1572 = vmatprep.mubr.msk.bf16.mxu1 %vm366_vm0, %v1663_v61  ;;  %1580 = vmatpush1.bf16.xpose.msra.mxu1 %v1670_v3 }
  0x84   : > { %1577 = vmatprep.subr.bf16.mxu1 %v1675_v4 }
  0x88   : > { %1549 = vmatmul.mubr.msk.bf16.gmra.mrb[12].mxu0 %vm366_vm0, %v1663_v61 }
  0x89   : > { %1151 = vmatpush1.bf16.xpose.msra.mxu0 %v1673_v5 }
  0x8a   : > { %1573 = vmatmul.mubr.msk.bf16.gmra.mrb[12].mxu1 %vm366_vm0, %v1663_v61 }
  0x8b   : > { %1581 = vmatpush1.bf16.xpose.msra.mxu1 %v1673_v5 }
  0xb6   : > { %v1035_v51 = vpop.permute.xlu0 %1034 }
  0xb7   : > { %v2044_v52 = vpop.permute.xlu1 %1054 }
 0x143   : > { %v1992_v6 = vpop.f32.mrb[0].mxu0 }
 0x144   : > { %v1482_v7 = vmul.f32 -1.442695, %v1992_v6  ;;  %v1995_v8 = vpop.f32.mrb[1].mxu0 }
 0x145   : > { %v1483_v9 = vmul.f32 -1.442695, %v1995_v8  ;;  %v1998_v10 = vpop.f32.mrb[2].mxu0  ;;  %v2006_v15 = vpop.f32.mrb[0].mxu1 }
 0x146   : > { %1676 = vpow2.f32 %v1482_v7  ;;  %v1484_v11 = vmul.f32 -1.442695, %v1998_v10  ;;  %v2001_v12 = vpop.f32.mrb[3].mxu0  ;;  %v2011_v18 = vpop.f32.mrb[1].mxu1 }
 0x147   : > { %1678 = vpow2.f32 %v1483_v9  ;;  %v1485_v13 = vmul.f32 -1.442695, %v2001_v12  ;;  %v2016_v21 = vpop.f32.mrb[2].mxu1 }
 0x148   : > { %1680 = vpow2.f32 %v1484_v11  ;;  %v2021_v24 = vpop.f32.mrb[3].mxu1 }
 0x149   : > { %1682 = vpow2.f32 %v1485_v13 }
 0x14b   : > { %v2004_v14 = vpop.f32.mrb[4].mxu0 }
 0x14c   : > { %v1486_v16 = vmul.f32 -1.442695, %v2004_v14  ;;  %v2009_v17 = vpop.f32.mrb[5].mxu0 }
 0x14d   : > { %v1487_v19 = vmul.f32 -1.442695, %v2009_v17  ;;  %v2014_v20 = vpop.f32.mrb[6].mxu0  ;;  %v2026_v34 = vpop.f32.mrb[4].mxu1 }
 0x14e   : > { %1684 = vpow2.f32 %v1486_v16  ;;  %v1488_v22 = vmul.f32 -1.442695, %v2014_v20  ;;  %v2019_v23 = vpop.f32.mrb[7].mxu0  ;;  %v2031_v38 = vpop.f32.mrb[5].mxu1 }
 0x14f   : > { %1686 = vpow2.f32 %v1487_v19  ;;  %v1489_v25 = vmul.f32 -1.442695, %v2019_v23  ;;  %v2036_v41 = vpop.f32.mrb[6].mxu1 }
 0x150   : > { %v1677_v26 = vpop.eup %1676  ;;  %1688 = vpow2.f32 %v1488_v22  ;;  %v2041_v44 = vpop.f32.mrb[7].mxu1 }
 0x151   : > { %v1679_v27 = vpop.eup %1678  ;;  %v944_v28 = vadd.f32 1.0, %v1677_v26  ;;  %1690 = vpow2.f32 %v1489_v25  ;;  %v1040_v26 = vpop.permute.xlu0 %1039 }
 0x152   : > { %v1681_v29 = vpop.eup %1680  ;;  %v945_v30 = vadd.f32 1.0, %v1679_v27 }
 0x153   : > { %v1683_v31 = vpop.eup %1682  ;;  %1692 = vrcp.f32 %v944_v28  ;;  %v946_v32 = vadd.f32 1.0, %v1681_v29  ;;  %v2024_v33 = vpop.f32.mrb[8].mxu0 }
 0x154   : > { %1694 = vrcp.f32 %v945_v30  ;;  %v947_v35 = vadd.f32 1.0, %v1683_v31  ;;  %v1490_v36 = vmul.f32 -1.442695, %v2024_v33  ;;  %v2029_v37 = vpop.f32.mrb[9].mxu0 }
 0x155   : > { %1696 = vrcp.f32 %v946_v32  ;;  %v1491_v39 = vmul.f32 -1.442695, %v2029_v37  ;;  %v2034_v40 = vpop.f32.mrb[10].mxu0  ;;  %v2048_v56 = vpop.f32.mrb[8].mxu1 }
 0x156   : > { %1698 = vrcp.f32 %v947_v35  ;;  %v1492_v42 = vmul.f32 -1.442695, %v2034_v40  ;;  %v2039_v43 = vpop.f32.mrb[11].mxu0  ;;  %v2053_v60 = vpop.f32.mrb[9].mxu1 }
 0x157   : > { %1700 = vpow2.f32 %v1490_v36  ;;  %v1493_v45 = vmul.f32 -1.442695, %v2039_v43  ;;  %v2058_v0 = vpop.f32.mrb[10].mxu1 }
 0x158   : > { %v1685_v46 = vpop.eup %1684  ;;  %1702 = vpow2.f32 %v1491_v39  ;;  %v2064_v5 = vpop.f32.mrb[11].mxu1 }
 0x159   : > { %v1687_v47 = vpop.eup %1686  ;;  %v948_v48 = vadd.f32 1.0, %v1685_v46  ;;  %1704 = vpow2.f32 %v1492_v42 }
 0x15a   : > { %v1689_v49 = vpop.eup %1688  ;;  %v949_v50 = vadd.f32 1.0, %v1687_v47  ;;  %1706 = vpow2.f32 %v1493_v45 }
 0x15b   : > { %v1691_v53 = vpop.eup %1690  ;;  %1708 = vrcp.f32 %v948_v48  ;;  %v950_v54 = vadd.f32 1.0, %v1689_v49  ;;  %v2046_v55 = vpop.f32.mrb[12].mxu0 }
 0x15c   : > { %1710 = vrcp.f32 %v949_v50  ;;  %v951_v57 = vadd.f32 1.0, %v1691_v53  ;;  %v1494_v58 = vmul.f32 -1.442695, %v2046_v55  ;;  %v2051_v59 = vpop.f32.mrb[13].mxu0 }
 0x15d   : > { %v1693_v61 = vpop.eup %1692  ;;  %1712 = vrcp.f32 %v950_v54  ;;  %v1495_v62 = vmul.f32 -1.442695, %v2051_v59  ;;  %v2056_v63 = vpop.f32.mrb[14].mxu0 }
 0x15e   : > { %v1695_v1 = vpop.eup %1694  ;;  %v992_v2 = vmul.f32 %v1693_v61, %v1992_v6  ;;  %1714 = vrcp.f32 %v951_v57  ;;  %v1496_v3 = vmul.f32 -1.442695, %v2056_v63  ;;  %v2062_v4 = vpop.f32.mrb[15].mxu0 }
 0x15f   : > { %v1697_v7 = vpop.eup %1696  ;;  %v993_v9 = vmul.f32 %v1695_v1, %v1995_v8  ;;  %1716 = vpow2.f32 %v1494_v58  ;;  %v1497_v11 = vmul.f32 -1.442695, %v2062_v4  ;;  %v2076_v32 = vpop.f32.mrb[12].mxu1 }
 0x160   : > { %v1699_v13 = vpop.eup %1698  ;;  %v994_v16 = vmul.f32 %v1697_v7, %v1998_v10  ;;  %1718 = vpow2.f32 %v1495_v62  ;;  %v1008_v19 = vmul.f32 %v992_v2, %v2006_v15  ;;  %v2074_v10 = vpop.permute.xlu1 %1059 }
 0x161   : > { %v1701_v6 = vpop.eup %1700  ;;  %v995_v22 = vmul.f32 %v1699_v13, %v2001_v12  ;;  %1720 = vpow2.f32 %v1496_v3  ;;  %v1009_v25 = vmul.f32 %v993_v9, %v2011_v18  ;;  %v2078_v18 = vpop.f32.mrb[13].mxu1 }
 0x162   : > { %v1703_v27 = vpop.eup %1702  ;;  %v952_v28 = vadd.f32 1.0, %v1701_v6  ;;  %1722 = vpow2.f32 %v1497_v11  ;;  %v1010_v8 = vmul.f32 %v994_v16, %v2016_v21  ;;  %v1072_v35 = vmul.f32 %v1035_v51, %v1008_v19  ;;  %v2080_v46 = vpop.f32.mrb[14].mxu1 }
 0x163   : > { %v1705_v29 = vpop.eup %1704  ;;  %v953_v30 = vadd.f32 1.0, %v1703_v27  ;;  %v1011_v31 = vmul.f32 %v995_v22, %v2021_v24  ;;  %v1073_v45 = vmul.f32 %v1035_v51, %v1009_v25  ;;  %v2083_v49 = vpop.f32.mrb[15].mxu1 }
 0x164   : > { %v1707_v15 = vpop.eup %1706  ;;  %1724 = vrcp.f32 %v952_v28  ;;  %v954_v12 = vadd.f32 1.0, %v1705_v29  ;;  %v1074_v36 = vmul.f32 %v1040_v26, %v1010_v8  ;;  %v1050_v2 = vpop.permute.xlu1 %1049 }
 0x165   : > { %v1709_v39 = vpop.eup %1708  ;;  %1726 = vrcp.f32 %v953_v30  ;;  %v955_v42 = vadd.f32 1.0, %v1707_v15  ;;  %v1075_v21 = vmul.f32 %v1040_v26, %v1011_v31 }
 0x166   : > { %v1711_v47 = vpop.eup %1710  ;;  %v996_v24 = vmul.f32 %v1709_v39, %v2004_v14  ;;  %1728 = vrcp.f32 %v954_v12  ;;  %v1088_v48 = vpack.c.bf16 %v1074_v36, %v1072_v35  ;;  %v1045_v14 = vpop.permute.xlu0 %1044 }
 0x167   : > { %v1713_v50 = vpop.eup %1712  ;;  %v997_v53 = vmul.f32 %v1711_v47, %v2009_v17  ;;  %1730 = vrcp.f32 %v955_v42  ;;  %v1089_v54 = vpack.c.bf16 %v1075_v21, %v1073_v45 }
 0x168   : > { %v1715_v57 = vpop.eup %1714  ;;  %v998_v58 = vmul.f32 %v1713_v50, %v2014_v20  ;;  %v1012_v51 = vmul.f32 %v996_v24, %v2026_v34 }
 0x169   : > { %v1717_v61 = vpop.eup %1716  ;;  %v999_v62 = vmul.f32 %v1715_v57, %v2019_v23  ;;  %v1013_v1 = vmul.f32 %v997_v53, %v2031_v38  ;;  %1176 = vmatprep.mubr.bf16.mxu0 %v1089_v54 }
 0x16a   : > { %v1719_v3 = vpop.eup %1718  ;;  %v956_v7 = vadd.f32 1.0, %v1717_v61  ;;  %v1014_v9 = vmul.f32 %v998_v58, %v2036_v41  ;;  %1177 = vmatmul.mubr.bf16.vlgmr.msra.gmra.mrb[16].mxu0 %v1088_v48  ;;  %v1076_v16 = vmul.f32 %v1045_v14, %v1012_v51  ;;  %v1097_v51 = vld [vmem:[#allocation2 + $0x8] sm:$0xff] }
 0x16b   : > { %v1721_v17 = vpop.eup %1720  ;;  %v957_v11 = vadd.f32 1.0, %v1719_v3  ;;  %v1015_v13 = vmul.f32 %v999_v62, %v2041_v44  ;;  %v1077_v38 = vmul.f32 %v1045_v14, %v1013_v1 }
 0x16c   : > { %v1723_v20 = vpop.eup %1722  ;;  %1732 = vrcp.f32 %v956_v7  ;;  %v958_v34 = vadd.f32 1.0, %v1721_v17  ;;  %v1078_v19 = vmul.f32 %v1050_v2, %v1014_v9 }
 0x16d   : > { %1734 = vrcp.f32 %v957_v11  ;;  %v959_v23 = vadd.f32 1.0, %v1723_v20  ;;  %v1079_v6 = vmul.f32 %v1050_v2, %v1015_v13  ;;  %v1099_v2 = vld [vmem:[#allocation2 + $0x18] sm:$0xff]  ;;  %v1100_v13 = vld [vmem:[#allocation2 + $0x20] sm:$0xff] }
 0x16e   : > { %v1725_v22 = vpop.eup %1724  ;;  %1736 = vrcp.f32 %v958_v34  ;;  %v1090_v25 = vpack.c.bf16 %v1078_v19, %v1076_v16  ;;  %v1101_v34 = vld [vmem:[#allocation2 + $0x28] sm:$0xff] }
 0x16f   : > { %v1727_v26 = vpop.eup %1726  ;;  %v1000_v41 = vmul.f32 %v1725_v22, %v2024_v33  ;;  %1738 = vrcp.f32 %v959_v23  ;;  %v1091_v27 = vpack.c.bf16 %v1079_v6, %v1077_v38  ;;  %v1102_v22 = vld [vmem:[#allocation2 + $0x30] sm:$0xff] }
 0x170   : > { %v1729_v28 = vpop.eup %1728  ;;  %v1001_v44 = vmul.f32 %v1727_v26, %v2029_v37  ;;  %v1103_v26 = vld [vmem:[#allocation2 + $0x38] sm:$0xff] }
 0x171   : > { %v1731_v8 = vpop.eup %1730  ;;  %v1002_v29 = vmul.f32 %v1729_v28, %v2034_v40  ;;  %v1016_v30 = vmul.f32 %v1000_v41, %v2048_v56  ;;  %1184 = vmatprep.mubr.bf16.mxu0 %v1091_v27 }
 0x172   : > { %v1003_v31 = vmul.f32 %v1731_v8, %v2039_v43  ;;  %v1017_v15 = vmul.f32 %v1001_v44, %v2053_v60  ;;  %1185 = vmatmul.mubr.bf16.gmra.mrb[20].mxu0 %v1090_v25 }
 0x173   : > { %v1018_v12 = vmul.f32 %v1002_v29, %v2058_v0  ;;  %v1080_v35 = vmul.f32 %v2044_v52, %v1016_v30 }
 0x174   : > { %v1019_v33 = vmul.f32 %v1003_v31, %v2064_v5  ;;  %v1081_v39 = vmul.f32 %v2044_v52, %v1017_v15 }
 0x175   : > { %v1082_v36 = vmul.f32 %v2074_v10, %v1018_v12 }
 0x176   : > { %v1733_v37 = vpop.eup %1732  ;;  %v1083_v40 = vmul.f32 %v2074_v10, %v1019_v33  ;;  %v1070_v10 = vpop.permute.xlu1 %1069 }
 0x177   : > { %v1735_v56 = vpop.eup %1734  ;;  %v1004_v42 = vmul.f32 %v1733_v37, %v2046_v55  ;;  %v1092_v43 = vpack.c.bf16 %v1082_v36, %v1080_v35  ;;  %v1065_v55 = vpop.permute.xlu0 %1064 }
 0x178   : > { %v1737_v45 = vpop.eup %1736  ;;  %v1005_v60 = vmul.f32 %v1735_v56, %v2051_v59  ;;  %v1093_v21 = vpack.c.bf16 %v1083_v40, %v1081_v39 }
 0x179   : > { %v1739_v0 = vpop.eup %1738  ;;  %v1006_v5 = vmul.f32 %v1737_v45, %v2056_v63  ;;  %v1020_v47 = vmul.f32 %v1004_v42, %v2076_v32  ;;  %v1096_v32 = vld [vmem:[#allocation2] sm:$0xff] }
 0x17a   : > { %v1007_v24 = vmul.f32 %v1739_v0, %v2062_v4  ;;  %v1021_v48 = vmul.f32 %v1005_v60, %v2078_v18  ;;  %1192 = vmatprep.mubr.bf16.mxu1 %v1093_v21 }
 0x17b   : > { %v1022_v52 = vmul.f32 %v1006_v5, %v2080_v46  ;;  %1193 = vmatmul.mubr.bf16.vlgmr.msra.gmra.mrb[16].mxu1 %v1092_v43  ;;  %v1084_v53 = vmul.f32 %v1065_v55, %v1020_v47 }
 0x17c   : > { %v1023_v50 = vmul.f32 %v1007_v24, %v2083_v49  ;;  %v1085_v54 = vmul.f32 %v1065_v55, %v1021_v48  ;;  %v1098_v49 = vld [vmem:[#allocation2 + $0x10] sm:$0xff] }
 0x17d   : > { %v1086_v59 = vmul.f32 %v1070_v10, %v1022_v52 }
 0x17e   : > { %v1087_v57 = vmul.f32 %v1070_v10, %v1023_v50 }
 0x17f   : > { %v1094_v58 = vpack.c.bf16 %v1086_v59, %v1084_v53 }
 0x180   : > { %v1095_v63 = vpack.c.bf16 %v1087_v57, %v1085_v54 }
 0x182   : > { %1200 = vmatprep.mubr.bf16.mxu1 %v1095_v63 }
 0x183   : > { %1201 = vmatmul.mubr.bf16.gmra.mrb[20].mxu1 %v1094_v58 }
 0x23d   : > { %v1178_v4 = vpop.f32.mrb[16].mxu0 }
 0x23e   : > { %v1209_v18 = vadd.f32 %v1178_v4, %v1096_v32  ;;  %v1180_v61 = vpop.f32.mrb[17].mxu0 }
 0x23f   : > { %v1181_v62 = vpop.f32.mrb[18].mxu0 }
 0x240   : > { %1217 = vst.msk [vmem:[#allocation2] sm:$0xff] %vm366_vm0, %v1209_v18  ;;  %v1210_v46 = vadd.f32 %v1181_v62, %v1097_v51  ;;  %v1183_v1 = vpop.f32.mrb[19].mxu0 }
 0x242   : > { %1218 = vst.msk [vmem:[#allocation2 + $0x8] sm:$0xff] %vm366_vm0, %v1210_v46 }
 0x245   : > { %v1186_v14 = vpop.f32.mrb[20].mxu0 }
 0x246   : > { %v1211_v3 = vadd.f32 %v1186_v14, %v1098_v49  ;;  %v1188_v7 = vpop.f32.mrb[21].mxu0 }
 0x247   : > { %v1189_v9 = vpop.f32.mrb[22].mxu0 }
 0x248   : > { %1219 = vst.msk [vmem:[#allocation2 + $0x10] sm:$0xff] %vm366_vm0, %v1211_v3  ;;  %v1212_v17 = vadd.f32 %v1189_v9, %v1099_v2  ;;  %v1191_v11 = vpop.f32.mrb[23].mxu0 }
 0x24a   : > { %1220 = vst.msk [vmem:[#allocation2 + $0x18] sm:$0xff] %vm366_vm0, %v1212_v17 }
 0x24e   : > { %v1194_v20 = vpop.f32.mrb[16].mxu1 }
 0x24f   : > { %v1213_v16 = vadd.f32 %v1194_v20, %v1100_v13  ;;  %v1196_v19 = vpop.f32.mrb[17].mxu1 }
 0x250   : > { %v1197_v23 = vpop.f32.mrb[18].mxu1 }
 0x251   : > { %1221 = vst.msk [vmem:[#allocation2 + $0x20] sm:$0xff] %vm366_vm0, %v1213_v16  ;;  %v1214_v38 = vadd.f32 %v1197_v23, %v1101_v34  ;;  %v1199_v6 = vpop.f32.mrb[19].mxu1 }
 0x253   : > { %1222 = vst.msk [vmem:[#allocation2 + $0x28] sm:$0xff] %vm366_vm0, %v1214_v38 }
 0x256   : > { %v1202_v25 = vpop.f32.mrb[20].mxu1 }
 0x257   : > { %v1215_v41 = vadd.f32 %v1202_v25, %v1102_v22  ;;  %v1204_v27 = vpop.f32.mrb[21].mxu1 }
 0x258   : > { %v1205_v28 = vpop.f32.mrb[22].mxu1 }
 0x259   : > { %1223 = vst.msk [vmem:[#allocation2 + $0x30] sm:$0xff] %vm366_vm0, %v1215_v41  ;;  %v1216_v44 = vadd.f32 %v1205_v28, %v1103_v26  ;;  %v1207_v8 = vpop.f32.mrb[23].mxu1 }
 0x25b   : > { %1224 = vst.msk [vmem:[#allocation2 + $0x38] sm:$0xff] %vm366_vm0, %v1216_v44 }
 0x25c PF: > { %v1228_v29 = vld [vmem:[#allocation2] sm:$0xff]  ;;  %vm1268_vm1 = vcmask 519168   ;;  %v1229_v30 = vld [vmem:[#allocation2 + $0x8] sm:$0xff]  ;;  %v1230_v31 = vld [vmem:[#allocation2 + $0x10] sm:$0xff] }
 0x25d   : > { %v1518_v15 = vpack.c.bf16 %v1228_v29, %v1228_v29  ;;  %v1519_v12 = vpack.c.bf16 %v1229_v30, %v1229_v30  ;;  %v1520_v33 = vpack.c.bf16 %v1230_v31, %v1230_v31  ;;  %v1231_v35 = vld [vmem:[#allocation2 + $0x18] sm:$0xff]  ;;  %v1232_v36 = vld [vmem:[#allocation2 + $0x20] sm:$0xff]  ;;  %v1233_v37 = vld [vmem:[#allocation2 + $0x28] sm:$0xff] }
 0x25e   : > { %v1521_v39 = vpack.c.bf16 %v1231_v35, %v1231_v35  ;;  %v1522_v40 = vpack.c.bf16 %v1232_v36, %v1232_v36  ;;  %v1523_v56 = vpack.c.bf16 %v1233_v37, %v1233_v37 }
 0x25f   : > { %1269 = vst.msk [vmem:[%s1874_s23] sm:$0xf] %vm1268_vm1, %v1518_v15  ;;  %1270 = vst.msk [vmem:[%s1874_s23 + $0x4] sm:$0xf] %vm1268_vm1, %v1519_v12 }
 0x260   : > { %v1234_v42 = vld [vmem:[#allocation2 + $0x30] sm:$0xff]  ;;  %1271 = vst.msk [vmem:[%s1874_s23 + $0x8] sm:$0xf] %vm1268_vm1, %v1520_v33  ;;  %1272 = vst.msk [vmem:[%s1874_s23 + $0xc] sm:$0xf] %vm1268_vm1, %v1521_v39 }
 0x261   : > { %v1524_v45 = vpack.c.bf16 %v1234_v42, %v1234_v42  ;;  %1273 = vst.msk [vmem:[%s1874_s23 + $0x10] sm:$0xf] %vm1268_vm1, %v1522_v40  ;;  %1274 = vst.msk [vmem:[%s1874_s23 + $0x14] sm:$0xf] %vm1268_vm1, %v1523_v56 }
 0x262   : > { %v1235_v43 = vld [vmem:[#allocation2 + $0x38] sm:$0xff] }
 0x263   : > { %v1525_v60 = vpack.c.bf16 %v1235_v43, %v1235_v43  ;;  %1275 = vst.msk [vmem:[%s1874_s23 + $0x18] sm:$0xf] %vm1268_vm1, %v1524_v45 }
 0x265   : > { %1276 = vst.msk [vmem:[%s1874_s23 + $0x1c] sm:$0xf] %vm1268_vm1, %v1525_v60 }
 0x266 PF: > { %s26_s7 = sadd.s32 1, %s1788_s7   ;;  %s2152_s1 = smov %s1784_s30 }
 0x267   : > { %p23_p4 = scmp.ge.s32.totalorder %s26_s7, 7   ;;  %s2153_s30 = smov %s2155_s8 }
 0x269   :  { %25 = sbr.rel (!%p23_p4) target bundleno = 27 (0x1b), region = 88 }

</bundles_post_ra>
